<compile_context>
chip_gen: v6e
topology: v6e:2x2x1
jax: 0.10.0
libtpu: 0.0.40
codegen_flags: <defaults>
</compile_context>

<pallas_src>
import math

import jax
import jax.numpy as jnp
from jax import lax
from jax.experimental import pallas as pl
from jax.experimental.pallas import tpu as pltpu

B, S, D, H, DFF = 2, 8, 32, 4, 64       # batch, seq, d_model, heads, ffn hidden
DK = D // H                             # per-head dim (8)
TOT = B * S                             # fused batch*seq rows (16)
HT = H * TOT                            # head-stacked rows / score lanes (64)
EPS = 1e-6

# ---- packed per-layer parameter slab layout (all segments (8,128)-aligned) ----
P_ROWS, P_COLS = 72, 512
QKV_OFF, WO_OFF, W1_OFF, VEC_OFF = 0, 128, 256, 384     # lane offsets
W2_ROW = 8                                              # w2 lives at rows 8:72

# ---- packed constants slab (mask bias + head selector + block-diag ones) ----
C_COLS = 384
BIAS_OFF, HSEL_OFF, BONES_OFF = 0, 128, 256


def encoder_layer_kernel(x_ref, c_ref, w_ref, out_ref):
    l = pl.program_id(0)

    # Layer 0 seeds the VMEM-resident activation; layers l>0 read the previous
    # layer's output straight out of out_ref (same output block every step =>
    # resident across the layer axis, no HBM round-trip between layers).
    @pl.when(l == 0)
    def _():
        out_ref[...] = x_ref[...]

    x = out_ref[...]                                      # (TOT, D)

    # ---- precomputed constants: one slab, static views ----
    mask_bias = c_ref[0:TOT, BIAS_OFF:BIAS_OFF + HT]      # (16, 64) additive 0/-1e9
    head_sel = c_ref[0:HT, HSEL_OFF:HSEL_OFF + D]         # (64, 32) 0/1 head selector
    block_ones = c_ref[0:HT, BONES_OFF:BONES_OFF + HT]    # (64, 64) block-diag ones

    # ---- per-layer packed parameters: static views of one slab ----
    w_qkv = w_ref[0:D, QKV_OFF:QKV_OFF + 3 * D]           # wq pre-scaled by 1/sqrt(DK)
    w_o = w_ref[0:D, WO_OFF:WO_OFF + D]
    w_1 = w_ref[0:D, W1_OFF:W1_OFF + DFF]
    w_2 = w_ref[W2_ROW:W2_ROW + DFF, VEC_OFF:VEC_OFF + D]
    b_qkv = w_ref[0:1, VEC_OFF:VEC_OFF + 3 * D]           # bq pre-scaled by 1/sqrt(DK)
    b_o = w_ref[1:2, VEC_OFF:VEC_OFF + D]
    b_1 = w_ref[2:3, VEC_OFF:VEC_OFF + DFF]
    b_2 = w_ref[3:4, VEC_OFF:VEC_OFF + D]
    a_1 = w_ref[4:5, VEC_OFF:VEC_OFF + D]
    c_1 = w_ref[5:6, VEC_OFF:VEC_OFF + D]
    a_2 = w_ref[6:7, VEC_OFF:VEC_OFF + D]
    c_2 = w_ref[7:8, VEC_OFF:VEC_OFF + D]

    def layer_norm(y, a, c):
        # torch LayerNorm in the spec: unbiased std (D-1), eps added to std.
        mean = jnp.mean(y, axis=-1, keepdims=True)
        var = jnp.sum((y - mean) ** 2, axis=-1, keepdims=True) * (1.0 / (D - 1))
        inv = pl.reciprocal(jnp.sqrt(var) + EPS)          # exact, EUP path
        return a * (y - mean) * inv + c

    # ---- fused QKV projection: one (16,32) @ (32,96) MXU op ----
    qkv = jnp.dot(x, w_qkv, preferred_element_type=jnp.float32) + b_qkv
    q = qkv[:, 0:D]
    k = qkv[:, D:2 * D]
    v = qkv[:, 2 * D:3 * D]

    # ---- all heads at once: head-stacked K / V of shape (HT, D) ----
    # Row block h keeps only head h's DK columns (precomputed 0/1 selector).
    k_st = jnp.concatenate([k] * H, axis=0) * head_sel
    v_st = jnp.concatenate([v] * H, axis=0) * head_sel

    # scores[i, h*TOT + j] = q_h[i] . k_h[j] / sqrt(DK)  (scale folded into wq)
    scores = lax.dot_general(q, k_st, (((1,), (1,)), ((), ())),
                             preferred_element_type=jnp.float32) + mask_bias

    # Stabilised per-head softmax.  The global row max is a single constant
    # within each head's lane block, so subtracting it leaves every per-head
    # softmax unchanged (shift invariance) while preventing exp overflow.
    m = jnp.max(scores, axis=-1, keepdims=True)
    p = jnp.exp(scores - m)
    # Per-head denominators via one MXU matmul with the block-diagonal ones.
    denom = jnp.dot(p, block_ones, preferred_element_type=jnp.float32)
    p = p * pl.reciprocal(denom)                          # exact reciprocal

    # Heads come out already concatenated along lanes: (TOT, D).
    attn = jnp.dot(p, v_st, preferred_element_type=jnp.float32)
    attn = jnp.dot(attn, w_o, preferred_element_type=jnp.float32) + b_o

    # sublayer[0]: norm(x + dropout(self_attn(x)))   (dropout = identity)
    x1 = layer_norm(x + attn, a_1, c_1)

    # ---- position-wise feed forward: w2(relu(w1(x1))) ----
    hid = jnp.maximum(
        jnp.dot(x1, w_1, preferred_element_type=jnp.float32) + b_1, 0.0)
    ff = jnp.dot(hid, w_2, preferred_element_type=jnp.float32) + b_2

    # sublayer[1]: norm(x1 + dropout(feed_forward(x1)))
    out_ref[...] = layer_norm(x1 + ff, a_2, c_2)


def pack_params(params_list):
    """Pack each layer's 16 tensors into one (72, 512) slab -> (L, 72, 512).

    Done ONCE at parameter-load time (hoisted out of the forward path)."""
    scale = 1.0 / math.sqrt(DK)
    slabs = []
    for p in params_list:
        s = jnp.zeros((P_ROWS, P_COLS), jnp.float32)
        s = s.at[0:D, QKV_OFF + 0 * D:QKV_OFF + 1 * D].set(p["wq"] * scale)
        s = s.at[0:D, QKV_OFF + 1 * D:QKV_OFF + 2 * D].set(p["wk"])
        s = s.at[0:D, QKV_OFF + 2 * D:QKV_OFF + 3 * D].set(p["wv"])
        s = s.at[0:D, WO_OFF:WO_OFF + D].set(p["wo"])
        s = s.at[0:D, W1_OFF:W1_OFF + DFF].set(p["w1"])
        s = s.at[W2_ROW:W2_ROW + DFF, VEC_OFF:VEC_OFF + D].set(p["w2"])
        s = s.at[0, VEC_OFF + 0 * D:VEC_OFF + 1 * D].set(p["bq"] * scale)
        s = s.at[0, VEC_OFF + 1 * D:VEC_OFF + 2 * D].set(p["bk"])
        s = s.at[0, VEC_OFF + 2 * D:VEC_OFF + 3 * D].set(p["bv"])
        s = s.at[1, VEC_OFF:VEC_OFF + D].set(p["bo"])
        s = s.at[2, VEC_OFF:VEC_OFF + DFF].set(p["b1"])
        s = s.at[3, VEC_OFF:VEC_OFF + D].set(p["b2"])
        s = s.at[4, VEC_OFF:VEC_OFF + D].set(p["a1"])
        s = s.at[5, VEC_OFF:VEC_OFF + D].set(p["c1"])
        s = s.at[6, VEC_OFF:VEC_OFF + D].set(p["a2"])
        s = s.at[7, VEC_OFF:VEC_OFF + D].set(p["c2"])
        slabs.append(s)
    return jnp.stack(slabs)


def pack_consts(mask):
    """Mask bias + head selector + block-diag ones, packed into one (64, 384)
    slab.  Done ONCE at mask-build time (hoisted out of the forward path)."""
    # block-diagonal (B*S, B*S) batch mask -> additive bias, tiled per head.
    bd = (mask[:, :, None, :] *
          jnp.eye(B, dtype=mask.dtype)[:, None, :, None]).reshape(TOT, TOT)
    bias = jnp.where(jnp.tile(bd, (1, H)) == 0.0, jnp.float32(-1e9), 0.0)
    row_head = (jnp.arange(HT) // TOT)[:, None]
    head_sel = (row_head == (jnp.arange(D) // DK)[None, :]).astype(jnp.float32)
    blk = jnp.arange(HT) // TOT
    block_ones = (blk[:, None] == blk[None, :]).astype(jnp.float32)

    c = jnp.zeros((HT, C_COLS), jnp.float32)
    c = c.at[0:TOT, BIAS_OFF:BIAS_OFF + HT].set(bias)
    c = c.at[:, HSEL_OFF:HSEL_OFF + D].set(head_sel)
    c = c.at[:, BONES_OFF:BONES_OFF + HT].set(block_ones)
    return c


def _make_call(num_layers):
    const = lambda l: (0, 0)
    flops_per_layer = 2 * (TOT * D * 3 * D + TOT * D * HT + TOT * HT * HT +
                           TOT * HT * D + TOT * D * D + TOT * D * DFF +
                           TOT * DFF * D)
    cost = pl.CostEstimate(
        flops=num_layers * flops_per_layer,
        transcendentals=num_layers * (2 * TOT * HT + 4 * TOT),
        bytes_accessed=(2 * TOT * D * 4 + HT * C_COLS * 4 +
                        num_layers * P_ROWS * P_COLS * 4),
    )
    return pl.pallas_call(
        encoder_layer_kernel,
        out_shape=jax.ShapeDtypeStruct((TOT, D), jnp.float32),
        grid_spec=pltpu.PrefetchScalarGridSpec(
            num_scalar_prefetch=0,
            grid=(num_layers,),                           # layer axis
            in_specs=[
                pl.BlockSpec((TOT, D), const),            # activations (loaded once)
                pl.BlockSpec((HT, C_COLS), const),        # constants slab (loaded once)
                pl.BlockSpec((None, P_ROWS, P_COLS),
                             lambda l: (l, 0, 0)),        # per-layer params (pipelined)
            ],
            out_specs=pl.BlockSpec((TOT, D), const),      # VMEM-resident across layers
        ),
        compiler_params=pltpu.CompilerParams(
            dimension_semantics=("arbitrary",)),          # sequential layer chain
        cost_estimate=cost,
    )


@jax.jit
def encoder_forward(x, consts, wstack):
    """Apply wstack.shape[0] stacked EncoderLayers in one kernel launch.
    wstack.shape[0] == 1 is exactly the spec'd single EncoderLayer forward."""
    out = _make_call(wstack.shape[0])(x.reshape(TOT, D), consts, wstack)
    return out.reshape(B, S, D)


def reference_forward(x, mask, p):
    """Pure-JAX mirror of the PyTorch EncoderLayer forward (eval mode)."""
    def layer_norm(y, a, c):
        mean = jnp.mean(y, axis=-1, keepdims=True)
        std = jnp.sqrt(jnp.sum((y - mean) ** 2, axis=-1, keepdims=True) / (D - 1))
        return a * (y - mean) / (std + EPS) + c

    q = x @ p["wq"] + p["bq"]
    k = x @ p["wk"] + p["bk"]
    v = x @ p["wv"] + p["bv"]
    qh = q.reshape(B, S, H, DK).transpose(0, 2, 1, 3)    # (B,H,S,DK)
    kh = k.reshape(B, S, H, DK).transpose(0, 2, 1, 3)
    vh = v.reshape(B, S, H, DK).transpose(0, 2, 1, 3)
    scores = jnp.einsum("bhqd,bhkd->bhqk", qh, kh) / math.sqrt(DK)
    scores = jnp.where(mask[:, None, :, :] == 0.0, -1e9, scores)
    pattn = jax.nn.softmax(scores, axis=-1)
    attn = jnp.einsum("bhqk,bhkd->bhqd", pattn, vh)
    attn = attn.transpose(0, 2, 1, 3).reshape(B, S, D) @ p["wo"] + p["bo"]
    x1 = layer_norm(x + attn, p["a1"], p["c1"])
    ff = jnp.maximum(x1 @ p["w1"] + p["b1"], 0.0) @ p["w2"] + p["b2"]
    return layer_norm(x1 + ff, p["a2"], p["c2"])


def make_params(key):
    ks = jax.random.split(key, 16)
    scale = 0.05

    def w(k, shape):
        return jax.random.normal(k, shape, jnp.float32) * scale

    return {
        "wq": w(ks[0], (D, D)), "wk": w(ks[1], (D, D)),
        "wv": w(ks[2], (D, D)), "wo": w(ks[3], (D, D)),
        "w1": w(ks[4], (D, DFF)), "w2": w(ks[5], (DFF, D)),
        "bq": w(ks[6], (D,)), "bk": w(ks[7], (D,)),
        "bv": w(ks[8], (D,)), "bo": w(ks[9], (D,)),
        "b1": w(ks[10], (DFF,)), "b2": w(ks[11], (D,)),
        # LayerNorm affine params (perturbed around the module's ones/zeros
        # defaults so the packed a/c paths are actually exercised).
        "a1": 1.0 + w(ks[12], (D,)), "c1": w(ks[13], (D,)),
        "a2": 1.0 + w(ks[14], (D,)), "c2": w(ks[15], (D,)),
    }


if __name__ == "__main__":
    key = jax.random.PRNGKey(0)
    kx, kp = jax.random.split(key)
    x = jax.random.normal(kx, (B, S, D), jnp.float32)
    # Attention mask: batch 1 masks out the last 2 key positions (padding mask).
    mask = jnp.ones((B, S, S), jnp.float32)
    mask = mask.at[1, :, S - 2:].set(0.0)

    # Hoisted one-time packing (parameter-load / mask-build time).
    consts = pack_consts(mask)

    # --- single EncoderLayer: exactly the spec'd module forward ---
    params = make_params(kp)
    wstack1 = pack_params([params])
    out = jax.block_until_ready(encoder_forward(x, consts, wstack1))
    ref = reference_forward(x, mask, params)
    assert out.shape == (B, S, D)
    err1 = float(jnp.max(jnp.abs(out - ref)))
    assert err1 < 5e-3, err1

    # --- stacked layers: one launch amortizes kernel overhead over L layers ---
    L = 4
    plist = [make_params(k) for k in jax.random.split(jax.random.PRNGKey(1), L)]
    wstackL = pack_params(plist)
    outL = jax.block_until_ready(encoder_forward(x, consts, wstackL))
    refL = x
    for p in plist:
        refL = reference_forward(refL, mask, p)
    err2 = float(jnp.max(jnp.abs(outL - refL)))
    assert err2 < 2e-2, err2

    print("KERNEL_OK")
</pallas_src>

<mosaic_0001>
module attributes {stable_mosaic.version = 11 : i64} {
  func.func @encoder_layer_kernel(%arg0: i32, %arg1: memref<16x32xf32, #tpu.memory_space<vmem>>, %arg2: memref<64x384xf32, #tpu.memory_space<vmem>>, %arg3: memref<1x72x512xf32, #tpu.memory_space<vmem>>, %arg4: memref<16x32xf32, #tpu.memory_space<vmem>>) attributes {dimension_semantics = [#tpu.dimension_semantics<arbitrary>], iteration_bounds = array<i64: 1>, scalar_prefetch = 0 : i64, scratch_operands = 0 : i64, tpu.core_type = #tpu.core_type<tc>, window_params = [{pipeline_mode = #tpu.pipeline_mode<synchronous>, transform_indices = @transform_0, window_bounds = array<i64: 16, 32>}, {pipeline_mode = #tpu.pipeline_mode<synchronous>, transform_indices = @transform_1, window_bounds = array<i64: 64, 384>}, {transform_indices = @transform_2, window_bounds = array<i64: 1, 72, 512>}, {pipeline_mode = #tpu.pipeline_mode<synchronous>, transform_indices = @transform_3, window_bounds = array<i64: 16, 32>}]} {
    %c0_i32 = arith.constant 0 : i32
    %0 = arith.cmpi eq, %arg0, %c0_i32 : i32
    %1 = arith.extui %0 : i1 to i32
    %c0_i32_0 = arith.constant 0 : i32
    %2 = arith.cmpi ne, %1, %c0_i32_0 : i32
    scf.if %2 {
      %c0_53 = arith.constant 0 : index
      %c0_54 = arith.constant 0 : index
      %112 = vector.load %arg1[%c0_53, %c0_54] : memref<16x32xf32, #tpu.memory_space<vmem>>, vector<16x32xf32>
      %c0_55 = arith.constant 0 : index
      %c0_56 = arith.constant 0 : index
      %113 = vector.load %arg4[%c0_55, %c0_56] : memref<16x32xf32, #tpu.memory_space<vmem>>, vector<16x32xf32>
      tpu.vector_store %arg4[%c0_55, %c0_56], %112 {strides = array<i32>} : memref<16x32xf32, #tpu.memory_space<vmem>>, vector<16x32xf32>,
    } else {
    }
    %c0 = arith.constant 0 : index
    %c0_1 = arith.constant 0 : index
    %3 = vector.load %arg4[%c0, %c0_1] : memref<16x32xf32, #tpu.memory_space<vmem>>, vector<16x32xf32>
    %c0_2 = arith.constant 0 : index
    %c0_3 = arith.constant 0 : index
    %4 = vector.load %arg2[%c0_2, %c0_3] : memref<64x384xf32, #tpu.memory_space<vmem>>, vector<16x64xf32>
    %c0_4 = arith.constant 0 : index
    %c128 = arith.constant 128 : index
    %5 = vector.load %arg2[%c0_4, %c128] : memref<64x384xf32, #tpu.memory_space<vmem>>, vector<64x32xf32>
    %c0_5 = arith.constant 0 : index
    %c256 = arith.constant 256 : index
    %6 = vector.load %arg2[%c0_5, %c256] : memref<64x384xf32, #tpu.memory_space<vmem>>, vector<64x64xf32>
    %c0_6 = arith.constant 0 : index
    %c0_7 = arith.constant 0 : index
    %c0_8 = arith.constant 0 : index
    %7 = vector.load %arg3[%c0_6, %c0_7, %c0_8] : memref<1x72x512xf32, #tpu.memory_space<vmem>>, vector<1x32x96xf32>
    %8 = vector.shape_cast %7 : vector<1x32x96xf32> to vector<32x96xf32>
    %c0_9 = arith.constant 0 : index
    %c0_10 = arith.constant 0 : index
    %c128_11 = arith.constant 128 : index
    %9 = vector.load %arg3[%c0_9, %c0_10, %c128_11] : memref<1x72x512xf32, #tpu.memory_space<vmem>>, vector<1x32x32xf32>
    %10 = vector.shape_cast %9 : vector<1x32x32xf32> to vector<32x32xf32>
    %c0_12 = arith.constant 0 : index
    %c0_13 = arith.constant 0 : index
    %c256_14 = arith.constant 256 : index
    %11 = vector.load %arg3[%c0_12, %c0_13, %c256_14] : memref<1x72x512xf32, #tpu.memory_space<vmem>>, vector<1x32x64xf32>
    %12 = vector.shape_cast %11 : vector<1x32x64xf32> to vector<32x64xf32>
    %c0_15 = arith.constant 0 : index
    %c8 = arith.constant 8 : index
    %c384 = arith.constant 384 : index
    %13 = vector.load %arg3[%c0_15, %c8, %c384] : memref<1x72x512xf32, #tpu.memory_space<vmem>>, vector<1x64x32xf32>
    %14 = vector.shape_cast %13 : vector<1x64x32xf32> to vector<64x32xf32>
    %c0_16 = arith.constant 0 : index
    %c0_17 = arith.constant 0 : index
    %c384_18 = arith.constant 384 : index
    %15 = vector.load %arg3[%c0_16, %c0_17, %c384_18] : memref<1x72x512xf32, #tpu.memory_space<vmem>>, vector<1x1x96xf32>
    %16 = vector.shape_cast %15 : vector<1x1x96xf32> to vector<1x96xf32>
    %c0_19 = arith.constant 0 : index
    %c1 = arith.constant 1 : index
    %c384_20 = arith.constant 384 : index
    %17 = vector.load %arg3[%c0_19, %c1, %c384_20] : memref<1x72x512xf32, #tpu.memory_space<vmem>>, vector<1x1x32xf32>
    %18 = vector.shape_cast %17 : vector<1x1x32xf32> to vector<1x32xf32>
    %c0_21 = arith.constant 0 : index
    %c2 = arith.constant 2 : index
    %c384_22 = arith.constant 384 : index
    %19 = vector.load %arg3[%c0_21, %c2, %c384_22] : memref<1x72x512xf32, #tpu.memory_space<vmem>>, vector<1x1x64xf32>
    %20 = vector.shape_cast %19 : vector<1x1x64xf32> to vector<1x64xf32>
    %c0_23 = arith.constant 0 : index
    %c3 = arith.constant 3 : index
    %c384_24 = arith.constant 384 : index
    %21 = vector.load %arg3[%c0_23, %c3, %c384_24] : memref<1x72x512xf32, #tpu.memory_space<vmem>>, vector<1x1x32xf32>
    %22 = vector.shape_cast %21 : vector<1x1x32xf32> to vector<1x32xf32>
    %c0_25 = arith.constant 0 : index
    %c4 = arith.constant 4 : index
    %c384_26 = arith.constant 384 : index
    %23 = vector.load %arg3[%c0_25, %c4, %c384_26] : memref<1x72x512xf32, #tpu.memory_space<vmem>>, vector<1x1x32xf32>
    %24 = vector.shape_cast %23 : vector<1x1x32xf32> to vector<1x32xf32>
    %c0_27 = arith.constant 0 : index
    %c5 = arith.constant 5 : index
    %c384_28 = arith.constant 384 : index
    %25 = vector.load %arg3[%c0_27, %c5, %c384_28] : memref<1x72x512xf32, #tpu.memory_space<vmem>>, vector<1x1x32xf32>
    %26 = vector.shape_cast %25 : vector<1x1x32xf32> to vector<1x32xf32>
    %c0_29 = arith.constant 0 : index
    %c6 = arith.constant 6 : index
    %c384_30 = arith.constant 384 : index
    %27 = vector.load %arg3[%c0_29, %c6, %c384_30] : memref<1x72x512xf32, #tpu.memory_space<vmem>>, vector<1x1x32xf32>
    %28 = vector.shape_cast %27 : vector<1x1x32xf32> to vector<1x32xf32>
    %c0_31 = arith.constant 0 : index
    %c7 = arith.constant 7 : index
    %c384_32 = arith.constant 384 : index
    %29 = vector.load %arg3[%c0_31, %c7, %c384_32] : memref<1x72x512xf32, #tpu.memory_space<vmem>>, vector<1x1x32xf32>
    %30 = vector.shape_cast %29 : vector<1x1x32xf32> to vector<1x32xf32>
    %cst = arith.constant dense<0.000000e+00> : vector<16x96xf32>
    %31 = tpu.matmul %3, %8, %cst {dimension_numbers = #tpu.dot_dimension_numbers<[1], [0], [0], [1], [0, 0, 1, 1], [], []>} : vector<16x32xf32>, vector<32x96xf32>, vector<16x96xf32> -> vector<16x96xf32>
    %32 = vector.broadcast %16 : vector<1x96xf32> to vector<16x96xf32>
    %33 = arith.addf %31, %32 : vector<16x96xf32>
    %34 = vector.extract_strided_slice %33 {offsets = [0, 0], sizes = [16, 32], strides = [1, 1]} : vector<16x96xf32> to vector<16x32xf32>
    %35 = vector.extract_strided_slice %33 {offsets = [0, 32], sizes = [16, 32], strides = [1, 1]} : vector<16x96xf32> to vector<16x32xf32>
    %36 = vector.extract_strided_slice %33 {offsets = [0, 64], sizes = [16, 32], strides = [1, 1]} : vector<16x96xf32> to vector<16x32xf32>
    %37 = tpu.concatenate %35, %35, %35, %35 in 0 : vector<16x32xf32>, vector<16x32xf32>, vector<16x32xf32>, vector<16x32xf32> -> vector<64x32xf32>
    %38 = arith.mulf %37, %5 : vector<64x32xf32>
    %39 = tpu.concatenate %36, %36, %36, %36 in 0 : vector<16x32xf32>, vector<16x32xf32>, vector<16x32xf32>, vector<16x32xf32> -> vector<64x32xf32>
    %40 = arith.mulf %39, %5 : vector<64x32xf32>
    %cst_33 = arith.constant dense<0.000000e+00> : vector<16x64xf32>
    %41 = tpu.matmul %34, %38, %cst_33 {dimension_numbers = #tpu.dot_dimension_numbers<[1], [1], [0], [0], [0, 0, 1, 0], [], []>} : vector<16x32xf32>, vector<64x32xf32>, vector<16x64xf32> -> vector<16x64xf32>
    %42 = arith.addf %41, %4 : vector<16x64xf32>
    %cst_34 = arith.constant dense<0xFF800000> : vector<16xf32>
    %43 = vector.multi_reduction <maximumf>, %42, %cst_34 [1] : vector<16x64xf32> to vector<16xf32>
    %44 = vector.shape_cast %43 : vector<16xf32> to vector<16x1xf32>
    %45 = vector.broadcast %44 : vector<16x1xf32> to vector<16x64xf32>
    %46 = arith.subf %42, %45 : vector<16x64xf32>
    %47 = math.exp %46 : vector<16x64xf32>
    %cst_35 = arith.constant dense<0.000000e+00> : vector<16x64xf32>
    %48 = tpu.matmul %47, %6, %cst_35 {dimension_numbers = #tpu.dot_dimension_numbers<[1], [0], [0], [1], [0, 0, 1, 1], [], []>} : vector<16x64xf32>, vector<64x64xf32>, vector<16x64xf32> -> vector<16x64xf32>
    %49 = tpu.reciprocal %48 : vector<16x64xf32> -> vector<16x64xf32>
    %50 = arith.mulf %47, %49 : vector<16x64xf32>
    %cst_36 = arith.constant dense<0.000000e+00> : vector<16x32xf32>
    %51 = tpu.matmul %50, %40, %cst_36 {dimension_numbers = #tpu.dot_dimension_numbers<[1], [0], [0], [1], [0, 0, 1, 1], [], []>} : vector<16x64xf32>, vector<64x32xf32>, vector<16x32xf32> -> vector<16x32xf32>
    %cst_37 = arith.constant dense<0.000000e+00> : vector<16x32xf32>
    %52 = tpu.matmul %51, %10, %cst_37 {dimension_numbers = #tpu.dot_dimension_numbers<[1], [0], [0], [1], [0, 0, 1, 1], [], []>} : vector<16x32xf32>, vector<32x32xf32>, vector<16x32xf32> -> vector<16x32xf32>
    %53 = vector.broadcast %18 : vector<1x32xf32> to vector<16x32xf32>
    %54 = arith.addf %52, %53 : vector<16x32xf32>
    %55 = arith.addf %3, %54 : vector<16x32xf32>
    %cst_38 = arith.constant dense<0.000000e+00> : vector<16xf32>
    %56 = vector.multi_reduction <add>, %55, %cst_38 [1] : vector<16x32xf32> to vector<16xf32>
    %57 = vector.shape_cast %56 : vector<16xf32> to vector<16x1xf32>
    %cst_39 = arith.constant 3.200000e+01 : f32
    %58 = vector.broadcast %cst_39 : f32 to vector<16x1xf32>
    %59 = arith.divf %57, %58 : vector<16x1xf32>
    %60 = vector.broadcast %59 : vector<16x1xf32> to vector<16x32xf32>
    %61 = arith.subf %55, %60 : vector<16x32xf32>
    %62 = arith.mulf %61, %61 : vector<16x32xf32>
    %cst_40 = arith.constant dense<0.000000e+00> : vector<16xf32>
    %63 = vector.multi_reduction <add>, %62, %cst_40 [1] : vector<16x32xf32> to vector<16xf32>
    %64 = vector.shape_cast %63 : vector<16xf32> to vector<16x1xf32>
    %cst_41 = arith.constant 0.0322580636 : f32
    %65 = vector.broadcast %cst_41 : f32 to vector<16x1xf32>
    %66 = arith.mulf %64, %65 : vector<16x1xf32>
    %67 = math.sqrt %66 : vector<16x1xf32>
    %cst_42 = arith.constant 9.99999997E-7 : f32
    %68 = vector.broadcast %cst_42 : f32 to vector<16x1xf32>
    %69 = arith.addf %67, %68 : vector<16x1xf32>
    %70 = tpu.reciprocal %69 : vector<16x1xf32> -> vector<16x1xf32>
    %71 = vector.broadcast %59 : vector<16x1xf32> to vector<16x32xf32>
    %72 = arith.subf %55, %71 : vector<16x32xf32>
    %73 = vector.broadcast %24 : vector<1x32xf32> to vector<16x32xf32>
    %74 = arith.mulf %73, %72 : vector<16x32xf32>
    %75 = vector.broadcast %70 : vector<16x1xf32> to vector<16x32xf32>
    %76 = arith.mulf %74, %75 : vector<16x32xf32>
    %77 = vector.broadcast %26 : vector<1x32xf32> to vector<16x32xf32>
    %78 = arith.addf %76, %77 : vector<16x32xf32>
    %cst_43 = arith.constant dense<0.000000e+00> : vector<16x64xf32>
    %79 = tpu.matmul %78, %12, %cst_43 {dimension_numbers = #tpu.dot_dimension_numbers<[1], [0], [0], [1], [0, 0, 1, 1], [], []>} : vector<16x32xf32>, vector<32x64xf32>, vector<16x64xf32> -> vector<16x64xf32>
    %80 = vector.broadcast %20 : vector<1x64xf32> to vector<16x64xf32>
    %81 = arith.addf %79, %80 : vector<16x64xf32>
    %cst_44 = arith.constant 0.000000e+00 : f32
    %82 = vector.broadcast %cst_44 : f32 to vector<16x64xf32>
    %83 = arith.maximumf %81, %82 : vector<16x64xf32>
    %cst_45 = arith.constant dense<0.000000e+00> : vector<16x32xf32>
    %84 = tpu.matmul %83, %14, %cst_45 {dimension_numbers = #tpu.dot_dimension_numbers<[1], [0], [0], [1], [0, 0, 1, 1], [], []>} : vector<16x64xf32>, vector<64x32xf32>, vector<16x32xf32> -> vector<16x32xf32>
    %85 = vector.broadcast %22 : vector<1x32xf32> to vector<16x32xf32>
    %86 = arith.addf %84, %85 : vector<16x32xf32>
    %87 = arith.addf %78, %86 : vector<16x32xf32>
    %cst_46 = arith.constant dense<0.000000e+00> : vector<16xf32>
    %88 = vector.multi_reduction <add>, %87, %cst_46 [1] : vector<16x32xf32> to vector<16xf32>
    %89 = vector.shape_cast %88 : vector<16xf32> to vector<16x1xf32>
    %cst_47 = arith.constant 3.200000e+01 : f32
    %90 = vector.broadcast %cst_47 : f32 to vector<16x1xf32>
    %91 = arith.divf %89, %90 : vector<16x1xf32>
    %92 = vector.broadcast %91 : vector<16x1xf32> to vector<16x32xf32>
    %93 = arith.subf %87, %92 : vector<16x32xf32>
    %94 = arith.mulf %93, %93 : vector<16x32xf32>
    %cst_48 = arith.constant dense<0.000000e+00> : vector<16xf32>
    %95 = vector.multi_reduction <add>, %94, %cst_48 [1] : vector<16x32xf32> to vector<16xf32>
    %96 = vector.shape_cast %95 : vector<16xf32> to vector<16x1xf32>
    %cst_49 = arith.constant 0.0322580636 : f32
    %97 = vector.broadcast %cst_49 : f32 to vector<16x1xf32>
    %98 = arith.mulf %96, %97 : vector<16x1xf32>
    %99 = math.sqrt %98 : vector<16x1xf32>
    %cst_50 = arith.constant 9.99999997E-7 : f32
    %100 = vector.broadcast %cst_50 : f32 to vector<16x1xf32>
    %101 = arith.addf %99, %100 : vector<16x1xf32>
    %102 = tpu.reciprocal %101 : vector<16x1xf32> -> vector<16x1xf32>
    %103 = vector.broadcast %91 : vector<16x1xf32> to vector<16x32xf32>
    %104 = arith.subf %87, %103 : vector<16x32xf32>
    %105 = vector.broadcast %28 : vector<1x32xf32> to vector<16x32xf32>
    %106 = arith.mulf %105, %104 : vector<16x32xf32>
    %107 = vector.broadcast %102 : vector<16x1xf32> to vector<16x32xf32>
    %108 = arith.mulf %106, %107 : vector<16x32xf32>
    %109 = vector.broadcast %30 : vector<1x32xf32> to vector<16x32xf32>
    %110 = arith.addf %108, %109 : vector<16x32xf32>
    %c0_51 = arith.constant 0 : index
    %c0_52 = arith.constant 0 : index
    %111 = vector.load %arg4[%c0_51, %c0_52] : memref<16x32xf32, #tpu.memory_space<vmem>>, vector<16x32xf32>
    tpu.vector_store %arg4[%c0_51, %c0_52], %110 {strides = array<i32>} : memref<16x32xf32, #tpu.memory_space<vmem>>, vector<16x32xf32>,
    return
  }
  func.func @transform_0(%arg0: i32) -> (i32, i32) {
    %c0_i32 = arith.constant 0 : i32
    %c0_i32_0 = arith.constant 0 : i32
    %c0_i32_1 = arith.constant 0 : i32
    return %c0_i32, %c0_i32_0 : i32, i32
  }
  func.func @transform_1(%arg0: i32) -> (i32, i32) {
    %c0_i32 = arith.constant 0 : i32
    %c0_i32_0 = arith.constant 0 : i32
    %c0_i32_1 = arith.constant 0 : i32
    return %c0_i32, %c0_i32_0 : i32, i32
  }
  func.func @transform_2(%arg0: i32) -> (i32, i32, i32) {
    %c0_i32 = arith.constant 0 : i32
    %c0_i32_0 = arith.constant 0 : i32
    %c0_i32_1 = arith.constant 0 : i32
    return %arg0, %c0_i32, %c0_i32_0 : i32, i32, i32
  }
  func.func @transform_3(%arg0: i32) -> (i32, i32) {
    %c0_i32 = arith.constant 0 : i32
    %c0_i32_0 = arith.constant 0 : i32
    %c0_i32_1 = arith.constant 0 : i32
    return %c0_i32, %c0_i32_0 : i32, i32
  }
}

</mosaic_0001>

<bundles_post_ra>
// kernel: encoder_forward.1
= control target key start
LH: loop header
LB: loop body
LE: loop exit
PB: predicated region body
PF: predicated region fallthrough
CT: control target
= control target key end

     0   :  { %8 = vsyncpa [#allocation3], 0  ;;  %s1449_s0 = inlined_call_operand.hbm [shape: f32[16,32], index: 0, kind: input, shape index: {}]   ;;  %s1450_s1 = inlined_call_operand.hbm [shape: f32[64,384], index: 1, kind: input, shape index: {}]   ;;  %s1451_s2 = inlined_call_operand.hbm [shape: f32[1,72,512], index: 2, kind: input, shape index: {}]   ;;  %s1452_s3 = inlined_call_operand.hbm [shape: f32[16,32], index: 3, kind: output, shape index: {}]  }
   0x1   :  { %9 = vsyncpa [#allocation6], 0 }
   0x2   :  { %10 = vsyncpa [#allocation4], 0  ;;  %s1268_s12 = smov [#allocation5]  }
   0x3   :  { %s28_s13 = sshll.u32 %s1268_s12, 4  ;;  %s29_s13 = int_to_ptr.vmem [resolvable:$true] %s28_s13 }
   0x4   :  { %s1190_s14 = scalar_lea.vmem %s29_s13, 3072  ;;  %p1195_p1 = scmp.lt.s32.totalorder %s29_s13, %s29_s13 }
   0x5   :  { %p1191_p0 = scmp.ne.s32.totalorder %s29_s13, %s1190_s14  ;;  %p1196_p2 = scmp.lt.s32.totalorder %s1190_s14, %s1190_s14 }
   0x7   :  { %p1197_p3 = por %p1196_p2, %p1195_p1 }
   0x9   :  { %p1198_p4 = pnand %p1197_p3, %p1191_p0 }
   0xb   :  { %1201 = shalt.err (!%p1198_p4)
}
   0xc   :  { %s1269_s15 = smov 384   ;;  %s1270_s16 = smov 24  }
   0xd   :  { %34 = dma.hbm_to_vmem [thread:$0]  %s1450_s1, 3072, %s29_s13, [#allocation6], %s1269_s15, %s1269_s15, %s1270_s16  }
   0xe   :  { %s1271_s19 = smov [#allocation2]  }
   0xf   :  { %s16_s20 = sshll.u32 %s1271_s19, 4  ;;  %s17_s20 = int_to_ptr.vmem [resolvable:$true] %s16_s20 }
  0x10   :  { %s1210_s21 = scalar_lea.vmem %s17_s20, 256  ;;  %p1215_p6 = scmp.lt.s32.totalorder %s17_s20, %s17_s20 }
  0x11   :  { %p1211_p5 = scmp.ne.s32.totalorder %s17_s20, %s1210_s21  ;;  %p1216_p7 = scmp.lt.s32.totalorder %s1210_s21, %s1210_s21 }
  0x13   :  { %p1217_p8 = por %p1216_p7, %p1215_p6 }
  0x15   :  { %p1218_p9 = pnand %p1217_p8, %p1211_p5 }
  0x17   :  { %1221 = shalt.err (!%p1218_p9)
}
  0x18   :  { %s1272_s22 = smov 128   ;;  %s1273_s23 = smov 8  }
  0x19   :  { %22 = dma.hbm_to_vmem [thread:$0]  %s1449_s0, 256, %s17_s20, [#allocation3], %s1272_s22, %s1272_s22, %s1273_s23  }
  0x1a   :  { %s1274_s1 = smov [#allocation7]  }
  0x1b   :  { %s40_s26 = sshll.u32 %s1274_s1, 4  ;;  %s41_s26 = int_to_ptr.vmem [resolvable:$true] %s40_s26 }
  0x1c   :  { %s1230_s27 = scalar_lea.vmem %s41_s26, 4608  ;;  %p1235_p11 = scmp.lt.s32.totalorder %s41_s26, %s41_s26 }
  0x1d   :  { %p1231_p10 = scmp.ne.s32.totalorder %s41_s26, %s1230_s27  ;;  %p1236_p12 = scmp.lt.s32.totalorder %s1230_s27, %s1230_s27 }
  0x1f   :  { %p1237_p13 = por %p1236_p12, %p1235_p11 }
  0x21   :  { %p1238_p0 = pnand %p1237_p13, %p1231_p10 }
  0x23   :  { %1241 = shalt.err (!%p1238_p0)
}
  0x24   :  { %s1275_s28 = smov 512   ;;  %s1276_s29 = smov 32  }
  0x25   :  { %46 = dma.hbm_to_vmem [thread:$0]  %s1451_s2, 4608, %s41_s26, [#allocation6], %s1275_s28, %s1275_s28, %s1276_s29  }
  0x26   :  { %1262 = dma.done.wait [#allocation3], 256  }
  0x27   :  { %1263 = vsyncadd [#allocation3], 4294967040 }
  0x28   :  { %1264 = dma.done.wait [#allocation6], 7680  }
  0x29   :  { %1265 = vsyncadd [#allocation6], 4294959616  ;;  %vm62_vm0 = vcmask 261120   ;;  %v88_v0 = vld [vmem:[#allocation7 + $0x60] sm:$0xff]  ;;  %v60_v2 = vld [vmem:[#allocation2] sm:$0xff]  ;;  %s1277_s0 = smov 96  }
  0x2a   :  { %v87_v1 = vld [vmem:[#allocation7 + $0x40] sm:$0xff]  ;;  %1037 = vmatprep.subr.mxu0 %v88_v0  ;;  %v61_v3 = vld [vmem:[#allocation2 + $0x8] sm:$0xff]  ;;  %63 = vst.msk [vmem:[#allocation8] sm:$0xff] %vm62_vm0, %v60_v2  ;;  %v1315_v5 = vld [vmem:[#allocation5 + $0xb0] sm:$0xff]  ;;  %vm388_vm1 = vcmask 523264   ;;  %s1278_s2 = smov 64  }
  0x2b   :  { %1038 = vmatpush3.msra.mxu0 %v88_v0  ;;  %v86_v4 = vld [vmem:[#allocation7 + $0x20] sm:$0xff]  ;;  %64 = vst.msk [vmem:[#allocation8 + $0x8] sm:$0xff] %vm62_vm0, %v61_v3  ;;  %217 = vrot.lane.b32.xlu0 %v1315_v5, %s1276_s29  ;;  %v1323_v8 = vld [vmem:[#allocation5 + $0x98] sm:$0xff]  ;;  %v1325_v9 = vld [vmem:[#allocation5 + $0x68] sm:$0xff]  ;;  %s1279_s5 = smov [#allocation8]  }
  0x2c   :  { %v1317_v6 = vld [vmem:[#allocation5 + $0x80] sm:$0xff]  ;;  %1039 = vmatprep.subr.mxu0 %v87_v1  ;;  %v1331_v10 = vld [vmem:[#allocation5 + $0x50] sm:$0xff]  ;;  %v1337_v13 = vld [vmem:[#allocation5 + $0x38] sm:$0xff]  ;;  %s944_s6 = sshll.u32 %s1279_s5, 4  ;;  %s945_s6 = int_to_ptr.vmem [resolvable:$true] %s944_s6 }
  0x2d   :  { %1040 = vmatpush3.msra.mxu0 %v87_v1  ;;  %v85_v7 = vld [vmem:[#allocation7] sm:$0xff]  ;;  %213 = vrot.lane.b32.xlu1 %v1317_v6, %s1276_s29  ;;  %v1349_v15 = vld [vmem:[#allocation5 + $0x8] sm:$0xff]  ;;  %v105_v18 = vld [vmem:[#allocation7 + $0x18] ss:$0 sm:$0xff]  ;;  %s1242_s7 = scalar_lea.vmem %s945_s6, 256  ;;  %p1247_p2 = scmp.lt.s32.totalorder %s945_s6, %s945_s6 }
  0x2e   :  { %1041 = vmatprep.subr.mxu0 %v86_v4  ;;  %v1347_v14 = vld [vmem:[#allocation5 + $0x20] sm:$0xff]  ;;  %v68_v45 = vld [vmem:[#allocation5 + $0x18] sm:$0xff]  ;;  %v82_v55 = vld [vmem:[#allocation5 + $0x88] sm:$0xff]  ;;  %p1243_p1 = scmp.ne.s32.totalorder %s945_s6, %s1242_s7  ;;  %p1248_p3 = scmp.lt.s32.totalorder %s1242_s7, %s1242_s7 }
  0x2f   :  { %1042 = vmatpush3.msra.mxu0 %v86_v4  ;;  %215 = vrot.lane.b32.xlu0 %v1323_v8, %s1276_s29  ;;  %v67_v47 = vld [vmem:[#allocation5] sm:$0xff]  ;;  %v84_v53 = vld [vmem:[#allocation5 + $0xb8] sm:$0xff]  ;;  %v81_v56 = vld [vmem:[#allocation5 + $0x70] sm:$0xff] }
  0x30   :  { %1043 = vmatprep.subr.mxu0 %v85_v7  ;;  %v83_v54 = vld [vmem:[#allocation5 + $0xa0] sm:$0xff]  ;;  %v80_v57 = vld [vmem:[#allocation5 + $0x58] sm:$0xff]  ;;  %v78_v59 = vld [vmem:[#allocation5 + $0x28] sm:$0xff]  ;;  %p1249_p4 = por %p1248_p3, %p1247_p2 }
  0x31   :  { %1044 = vmatpush3.msra.mxu0 %v85_v7  ;;  %211 = vrot.lane.b32.xlu1 %v1325_v9, %s1276_s29  ;;  %v1333_v11 = vld [vmem:[#allocation8] sm:$0xff]  ;;  %v77_v60 = vld [vmem:[#allocation5 + $0x10] sm:$0xff] }
  0x32   :  { %v1335_v12 = vld [vmem:[#allocation8 + $0x8] sm:$0xff]  ;;  %1045 = vmatprep.mubr.msk.f32.mxu0 %vm62_vm0, %v1333_v11  ;;  %1067 = vmatprep.subr.mxu0 %v84_v53  ;;  %v79_v58 = vld [vmem:[#allocation5 + $0x40] sm:$0xff]  ;;  %p1250_p5 = pnand %p1249_p4, %p1243_p1 }
  0x33   :  { %1046 = vmatmul.mubr.msk.f32.vlgmr.msra.gmra.mxu0 %vm62_vm0, %v1335_v12  ;;  %209 = vrot.lane.b32.xlu0 %v1331_v10, %s1276_s29 }
  0x34   :  { %1068 = vmatpush3.msra.mxu0 %v84_v53 }
  0x35   :  { %207 = vrot.lane.b32.xlu1 %v1337_v13, %s1276_s29  ;;  %1069 = vmatprep.subr.mxu0 %v83_v54 }
  0x36   :  { %1070 = vmatpush3.msra.mxu0 %v83_v54 }
  0x37   :  { %205 = vrot.lane.b32.xlu0 %v1347_v14, %s1276_s29  ;;  %1071 = vmatprep.subr.mxu0 %v82_v55 }
  0x38   :  { %1072 = vmatpush3.msra.mxu0 %v82_v55 }
  0x39   :  { %203 = vrot.lane.b32.xlu1 %v1349_v15, %s1276_s29  ;;  %1073 = vmatprep.subr.mxu0 %v81_v56 }
  0x3a   :  { %1074 = vmatpush3.msra.mxu0 %v81_v56 }
  0x3b   :  { %1075 = vmatprep.subr.mxu0 %v80_v57 }
  0x3c   :  { %1076 = vmatpush3.msra.mxu0 %v80_v57 }
  0x3d   :  { %1077 = vmatprep.subr.mxu0 %v79_v58 }
  0x3e   :  { %1078 = vmatpush3.msra.mxu0 %v79_v58 }
  0x3f   :  { %1079 = vmatprep.subr.mxu0 %v78_v59 }
  0x40   :  { %1080 = vmatpush3.msra.mxu0 %v78_v59 }
  0x41   :  { %1081 = vmatprep.subr.mxu0 %v77_v60 }
  0x42   :  { %1082 = vmatpush3.msra.mxu0 %v77_v60 }
  0x9d   :  { %v218_v16 = vpop.permute.xlu0 %217 }
  0x9f   :  { %v214_v17 = vpop.permute.xlu1 %213 }
  0xa1   :  { %v216_v19 = vpop.permute.xlu0 %215 }
  0xa3   :  { %v212_v22 = vpop.permute.xlu1 %211 }
  0xa5   :  { %v210_v27 = vpop.permute.xlu0 %209 }
  0xa7   :  { %v208_v29 = vpop.permute.xlu1 %207 }
  0xa9   :  { %v206_v32 = vpop.permute.xlu0 %205 }
  0xab   :  { %v204_v34 = vpop.permute.xlu1 %203 }
  0xf3   :  { %v1047_v20 = vpop.f32.mrf.mxu0 }
  0xf4   :  { %v1355_v21 = vadd.f32 %v1047_v20, %v105_v18 }
  0xf5   :  { %v186_v23 = vpop.f32.mrf.mxu0 }
  0xf6   :  { %v1357_v24 = vadd.f32 %v186_v23, %v105_v18  ;;  %v234_v25 = vmul.f32 %v218_v16, %v1355_v21  ;;  %v232_v28 = vmul.f32 %v214_v17, %v1355_v21  ;;  %v230_v31 = vmul.f32 %v210_v27, %v1355_v21 }
  0xf7   :  { %v228_v35 = vmul.f32 %v206_v32, %v1355_v21 }
  0xf8   :  { %289 = vrot.lane.b32.xlu0 %v234_v25, %s1277_s0  ;;  %1064 = vmatprep.mubr.msk.f32.mxu1 %vm62_vm0, %v1357_v24  ;;  %v233_v26 = vmul.f32 %v216_v19, %v1357_v24  ;;  %v231_v30 = vmul.f32 %v212_v22, %v1357_v24  ;;  %v229_v33 = vmul.f32 %v208_v29, %v1357_v24  ;;  %v92_v25 = vld [vmem:[#allocation7 + $0x68] sm:$0xff] }
  0xf9   :  { %v227_v36 = vmul.f32 %v204_v34, %v1357_v24 }
  0xfa   :  { %287 = vrot.lane.b32.xlu1 %v233_v26, %s1277_s0  ;;  %v91_v26 = vld [vmem:[#allocation7 + $0x48] sm:$0xff] }
  0xfc   :  { %285 = vrot.lane.b32.xlu0 %v232_v28, %s1277_s0 }
  0xfe   :  { %283 = vrot.lane.b32.xlu1 %v231_v30, %s1277_s0 }
 0x100   :  { %281 = vrot.lane.b32.xlu0 %v230_v31, %s1277_s0 }
 0x102   :  { %279 = vrot.lane.b32.xlu1 %v229_v33, %s1277_s0 }
 0x104   :  { %277 = vrot.lane.b32.xlu0 %v228_v35, %s1277_s0 }
 0x106   :  { %275 = vrot.lane.b32.xlu1 %v227_v36, %s1277_s0 }
 0x16a   :  { %v290_v37 = vpop.permute.xlu0 %289 }
 0x16b   :  { %1048 = vmatprep.subr.msk.mxu1 %vm62_vm0, %v290_v37 }
 0x16c   :  { %1049 = vmatpush3.xpose.msk.msra.mxu1 %vm62_vm0, %v290_v37  ;;  %v288_v38 = vpop.permute.xlu1 %287 }
 0x16d   :  { %1050 = vmatprep.subr.msk.mxu1 %vm62_vm0, %v288_v38 }
 0x16e   :  { %v286_v39 = vpop.permute.xlu0 %285 }
 0x170   :  { %1051 = vmatpush3.xpose.msk.msra.mxu1 %vm62_vm0, %v288_v38  ;;  %v284_v40 = vpop.permute.xlu1 %283 }
 0x171   :  { %1052 = vmatprep.subr.msk.mxu1 %vm62_vm0, %v286_v39 }
 0x172   :  { %v282_v41 = vpop.permute.xlu0 %281 }
 0x174   :  { %1053 = vmatpush3.xpose.msk.msra.mxu1 %vm62_vm0, %v286_v39  ;;  %v280_v42 = vpop.permute.xlu1 %279  ;;  %v90_v39 = vld [vmem:[#allocation7 + $0x28] sm:$0xff] }
 0x175   :  { %1054 = vmatprep.subr.msk.mxu1 %vm62_vm0, %v284_v40 }
 0x176   :  { %v278_v43 = vpop.permute.xlu0 %277 }
 0x178   :  { %1055 = vmatpush3.xpose.msk.msra.mxu1 %vm62_vm0, %v284_v40  ;;  %v276_v44 = vpop.permute.xlu1 %275  ;;  %v89_v40 = vld [vmem:[#allocation7 + $0x8] sm:$0xff] }
 0x179   :  { %1056 = vmatprep.subr.msk.mxu1 %vm62_vm0, %v282_v41 }
 0x17c   :  { %1057 = vmatpush3.xpose.msk.msra.mxu1 %vm62_vm0, %v282_v41 }
 0x17d   :  { %1058 = vmatprep.subr.msk.mxu1 %vm62_vm0, %v280_v42 }
 0x180   :  { %1059 = vmatpush3.xpose.msk.msra.mxu1 %vm62_vm0, %v280_v42 }
 0x181   :  { %1060 = vmatprep.subr.msk.mxu1 %vm62_vm0, %v278_v43 }
 0x184   :  { %1061 = vmatpush3.xpose.msk.msra.mxu1 %vm62_vm0, %v278_v43  ;;  %v106_v43 = vld [vmem:[#allocation7 + $0x19] ss:$0 sm:$0xff] }
 0x185   :  { %1062 = vmatprep.subr.msk.mxu1 %vm62_vm0, %v276_v44 }
 0x188   :  { %1063 = vmatpush3.xpose.msk.msra.mxu1 %vm62_vm0, %v276_v44 }
 0x189   :  { %1105 = vmatprep.subr.mxu1 %v92_v25 }
 0x18b   :  { %1065 = vmatmul.mubr.msk.f32.vlgmr.msra.gmra.mxu1 %vm62_vm0, %v1355_v21 }
 0x18c   :  { %1106 = vmatpush3.msra.mxu1 %v92_v25 }
 0x18d   :  { %1107 = vmatprep.subr.mxu1 %v91_v26 }
 0x18e   :  { %1108 = vmatpush3.msra.mxu1 %v91_v26 }
 0x18f   :  { %1109 = vmatprep.subr.mxu1 %v90_v39 }
 0x190   :  { %1110 = vmatpush3.msra.mxu1 %v90_v39 }
 0x191   :  { %1111 = vmatprep.subr.mxu1 %v89_v40 }
 0x192   :  { %1112 = vmatpush3.msra.mxu1 %v89_v40 }
 0x24b   :  { %v1066_v46 = vpop.f32.mrf.mxu1 }
 0x24c   :  { %v385_v48 = vadd.f32 %v1066_v46, %v68_v45 }
 0x24d   :  { %v379_v49 = vpop.f32.mrf.mxu1 }
 0x24e   :  { %v380_v50 = vadd.f32 %v379_v49, %v67_v47  ;;  %v392_v51 = vsel %vm388_vm1, %v385_v48, -inf }
 0x24f   :  { %393 = vmax.xlane.f32.xlu1 %v392_v51 }
 0x250   :  { %v389_v52 = vsel %vm388_vm1, %v380_v50, -inf }
 0x251   :  { %390 = vmax.xlane.f32.xlu0 %v389_v52 }
 0x260   :  { %247 = vrot.lane.b32.xlu1 %v1323_v8, %s1278_s2 }
 0x264   :  { %243 = vrot.lane.b32.xlu1 %v1325_v9, %s1278_s2 }
 0x267   :  { %249 = vrot.lane.b32.xlu0 %v1315_v5, %s1278_s2 }
 0x268   :  { %239 = vrot.lane.b32.xlu1 %v1337_v13, %s1278_s2 }
 0x26b   :  { %245 = vrot.lane.b32.xlu0 %v1317_v6, %s1278_s2 }
 0x26c   :  { %235 = vrot.lane.b32.xlu1 %v1349_v15, %s1278_s2 }
 0x26f   :  { %241 = vrot.lane.b32.xlu0 %v1331_v10, %s1278_s2 }
 0x273   :  { %237 = vrot.lane.b32.xlu0 %v1347_v14, %s1278_s2 }
 0x2d8   :  { %v394_v61 = vpop.xlane.xlu1 %393 }
 0x2d9   :  { %v396_v62 = vsub.f32 %v385_v48, %v394_v61  ;;  %v96_v61 = vld [vmem:[#allocation7 + $0x70] sm:$0xff] }
 0x2da   :  { %v391_v63 = vpop.xlane.xlu0 %390 }
 0x2db   :  { %v395_v0 = vsub.f32 %v380_v50, %v391_v63  ;;  %v399_v1 = vmul.f32 1.442695, %v396_v62  ;;  %v94_v62 = vld [vmem:[#allocation7 + $0x30] sm:$0xff] }
 0x2dc   :  { %v248_v2 = vpop.permute.xlu1 %247  ;;  %v93_v63 = vld [vmem:[#allocation7 + $0x10] sm:$0xff] }
 0x2dd   :  { %v397_v3 = vmul.f32 1.442695, %v395_v0  ;;  %v265_v4 = vmul.f32 %v248_v2, %v1357_v24  ;;  %v104_v0 = vld [vmem:[#allocation7 + $0x118] sm:$0xff] }
 0x2de   :  { %v250_v5 = vpop.permute.xlu0 %249  ;;  %1127 = vmatprep.subr.mxu1 %v104_v0  ;;  %v102_v2 = vld [vmem:[#allocation7 + $0xd8] sm:$0xff] }
 0x2df   :  { %1158 = vpow2.f32 %v397_v3  ;;  %v266_v6 = vmul.f32 %v250_v5, %v1355_v21  ;;  %506 = vrot.lane.b32.xlu1 %v265_v4, %s1278_s2  ;;  %v101_v3 = vld [vmem:[#allocation7 + $0xb8] sm:$0xff] }
 0x2e0   :  { %1160 = vpow2.f32 %v399_v1  ;;  %v244_v7 = vpop.permute.xlu1 %243  ;;  %v103_v1 = vld [vmem:[#allocation7 + $0xf8] sm:$0xff] }
 0x2e1   :  { %v263_v8 = vmul.f32 %v244_v7, %v1357_v24  ;;  %508 = vrot.lane.b32.xlu0 %v266_v6, %s1278_s2 }
 0x2e2   :  { %v246_v9 = vpop.permute.xlu0 %245 }
 0x2e3   :  { %v264_v10 = vmul.f32 %v246_v9, %v1355_v21  ;;  %502 = vrot.lane.b32.xlu1 %v263_v8, %s1278_s2 }
 0x2e4   :  { %v240_v13 = vpop.permute.xlu1 %239 }
 0x2e5   :  { %v261_v14 = vmul.f32 %v240_v13, %v1357_v24  ;;  %504 = vrot.lane.b32.xlu0 %v264_v10, %s1278_s2 }
 0x2e6   :  { %v242_v15 = vpop.permute.xlu0 %241 }
 0x2e7   :  { %v262_v16 = vmul.f32 %v242_v15, %v1355_v21  ;;  %498 = vrot.lane.b32.xlu1 %v261_v14, %s1278_s2 }
 0x2e8   :  { %v236_v17 = vpop.permute.xlu1 %235 }
 0x2e9   :  { %v259_v18 = vmul.f32 %v236_v17, %v1357_v24  ;;  %500 = vrot.lane.b32.xlu0 %v262_v16, %s1278_s2 }
 0x2ea   :  { %v238_v19 = vpop.permute.xlu0 %237 }
 0x2eb   :  { %v260_v20 = vmul.f32 %v238_v19, %v1355_v21  ;;  %494 = vrot.lane.b32.xlu1 %v259_v18, %s1278_s2 }
 0x2ec   :  { %v1159_v22 = vpop.eup %1158 }
 0x2ed   :  { %v1161_v23 = vpop.eup %1160  ;;  %1083 = vmatprep.mubr.msk.f32.mxu0 %vm388_vm1, %v1159_v22  ;;  %496 = vrot.lane.b32.xlu0 %v260_v20, %s1278_s2 }
 0x2ee   :  { %1084 = vmatmul.mubr.msk.f32.vlgmr.msra.gmra.mxu0 %vm388_vm1, %v1161_v23 }
 0x351   :  { %v507_v24 = vpop.permute.xlu1 %506 }
 0x353   :  { %v509_v27 = vpop.permute.xlu0 %508 }
 0x354   :  { %1086 = vmatprep.subr.mxu0 %v509_v27 }
 0x355   :  { %v503_v21 = vpop.permute.xlu1 %502  ;;  %1087 = vmatpush3.msra.mxu0 %v509_v27 }
 0x356   :  { %1088 = vmatprep.subr.mxu0 %v507_v24 }
 0x357   :  { %1089 = vmatpush3.msra.mxu0 %v507_v24  ;;  %v505_v28 = vpop.permute.xlu0 %504  ;;  %v110_v24 = vld [vmem:[#allocation7 + $0x1d] ss:$0 sm:$0xff] }
 0x358   :  { %1090 = vmatprep.subr.mxu0 %v505_v28 }
 0x359   :  { %1091 = vmatpush3.msra.mxu0 %v505_v28  ;;  %v499_v29 = vpop.permute.xlu1 %498 }
 0x35a   :  { %1092 = vmatprep.subr.mxu0 %v503_v21 }
 0x35b   :  { %1093 = vmatpush3.msra.mxu0 %v503_v21  ;;  %v501_v30 = vpop.permute.xlu0 %500 }
 0x35c   :  { %1094 = vmatprep.subr.mxu0 %v501_v30 }
 0x35d   :  { %1095 = vmatpush3.msra.mxu0 %v501_v30  ;;  %v495_v32 = vpop.permute.xlu1 %494 }
 0x35e   :  { %1096 = vmatprep.subr.mxu0 %v499_v29 }
 0x35f   :  { %1097 = vmatpush3.msra.mxu0 %v499_v29  ;;  %v497_v31 = vpop.permute.xlu0 %496 }
 0x360   :  { %1098 = vmatprep.subr.mxu0 %v497_v31 }
 0x361   :  { %1099 = vmatpush3.msra.mxu0 %v497_v31 }
 0x362   :  { %1100 = vmatprep.subr.mxu0 %v495_v32 }
 0x363   :  { %1101 = vmatpush3.msra.mxu0 %v495_v32  ;;  %v100_v32 = vld [vmem:[#allocation7 + $0x98] sm:$0xff] }
 0x364   :  { %1116 = vmatprep.subr.mxu0 %v96_v61 }
 0x3ae   :  { %v1085_v33 = vpop.f32.mrf.mxu0 }
 0x3af   :  { %1162 = vrcp.f32 %v1085_v33  ;;  %v99_v33 = vld [vmem:[#allocation7 + $0x78] sm:$0xff] }
 0x3b0   :  { %v473_v34 = vpop.f32.mrf.mxu0 }
 0x3b1   :  { %1164 = vrcp.f32 %v473_v34  ;;  %v98_v34 = vld [vmem:[#allocation7 + $0x58] sm:$0xff] }
 0x3bc   :  { %v1163_v35 = vpop.eup %1162 }
 0x3bd   :  { %v485_v38 = vmul.f32 %v1163_v35, %v1161_v23  ;;  %v109_v23 = vld [vmem:[#allocation7 + $0x1c] ss:$0 sm:$0xff] }
 0x3be   :  { %v1165_v36 = vpop.eup %1164  ;;  %v97_v35 = vld [vmem:[#allocation7 + $0x38] sm:$0xff] }
 0x3bf   :  { %v484_v37 = vmul.f32 %v1165_v36, %v1159_v22  ;;  %v107_v36 = vld [vmem:[#allocation7 + $0x1a] ss:$0 sm:$0xff] }
 0x3c1   :  { %1102 = vmatprep.mubr.msk.f32.mxu0 %vm388_vm1, %v484_v37 }
 0x3c2   :  { %1103 = vmatmul.mubr.msk.f32.vlgmr.msra.gmra.mxu0 %vm388_vm1, %v485_v38 }
 0x3c3   :  { %1117 = vmatpush3.msra.mxu0 %v96_v61 }
 0x482   :  { %v1104_v41 = vpop.f32.mrf.mxu0 }
 0x484   :  { %v590_v42 = vpop.f32.mrf.mxu0 }
 0x485   :  { %1113 = vmatprep.mubr.msk.f32.mxu1 %vm62_vm0, %v590_v42 }
 0x486   :  { %1114 = vmatmul.mubr.msk.f32.vlgmr.msra.gmra.mxu1 %vm62_vm0, %v1104_v41 }
 0x487   :  { %1128 = vmatpush3.msra.mxu1 %v104_v0 }
 0x488   :  { %1129 = vmatprep.subr.mxu1 %v103_v1 }
 0x489   :  { %1130 = vmatpush3.msra.mxu1 %v103_v1 }
 0x48a   :  { %1131 = vmatprep.subr.mxu1 %v102_v2 }
 0x48b   :  { %1132 = vmatpush3.msra.mxu1 %v102_v2 }
 0x48c   :  { %1133 = vmatprep.subr.mxu1 %v101_v3 }
 0x48d   :  { %1134 = vmatpush3.msra.mxu1 %v101_v3 }
 0x48e   :  { %1135 = vmatprep.subr.mxu1 %v100_v32 }
 0x48f   :  { %1136 = vmatpush3.msra.mxu1 %v100_v32 }
 0x490   :  { %1137 = vmatprep.subr.mxu1 %v99_v33 }
 0x491   :  { %1138 = vmatpush3.msra.mxu1 %v99_v33 }
 0x492   :  { %1139 = vmatprep.subr.mxu1 %v98_v34 }
 0x493   :  { %1140 = vmatpush3.msra.mxu1 %v98_v34 }
 0x494   :  { %1141 = vmatprep.subr.mxu1 %v97_v35 }
 0x495   :  { %1142 = vmatpush3.msra.mxu1 %v97_v35 }
 0x546   :  { %v1115_v44 = vpop.f32.mrf.mxu1 }
 0x547   :  { %v677_v45 = vadd.f32 %v1115_v44, %v106_v43 }
 0x548   :  { %v671_v46 = vpop.f32.mrf.mxu1 }
 0x549   :  { %v672_v47 = vadd.f32 %v671_v46, %v106_v43  ;;  %v681_v48 = vadd.f32 %v677_v45, %v1335_v12  ;;  %v108_v43 = vld [vmem:[#allocation7 + $0x1b] ss:$0 sm:$0xff] }
 0x54b   :  { %v685_v49 = vsel %vm62_vm0, %v681_v48, 0.0  ;;  %v680_v50 = vadd.f32 %v672_v47, %v1333_v11  ;;  %v95_v11 = vld [vmem:[#allocation7 + $0x50] sm:$0xff] }
 0x54c   :  { %686 = vadd.xlane.f32.xlu1 %v685_v49  ;;  %1118 = vmatprep.subr.mxu0 %v95_v11 }
 0x54d   :  { %v682_v51 = vsel %vm62_vm0, %v680_v50, 0.0  ;;  %1119 = vmatpush3.msra.mxu0 %v95_v11 }
 0x54e   :  { %683 = vadd.xlane.f32.xlu0 %v682_v51  ;;  %1120 = vmatprep.subr.mxu0 %v94_v62 }
 0x54f   :  { %1121 = vmatpush3.msra.mxu0 %v94_v62 }
 0x550   :  { %1122 = vmatprep.subr.mxu0 %v93_v63 }
 0x551   :  { %1123 = vmatpush3.msra.mxu0 %v93_v63 }
 0x5d5   :  { %v687_v52 = vpop.xlane.xlu1 %686 }
 0x5d6   :  { %v690_v53 = vmul.f32 0.03125, %v687_v52 }
 0x5d7   :  { %v684_v54 = vpop.xlane.xlu0 %683 }
 0x5d8   :  { %v689_v55 = vmul.f32 0.03125, %v684_v54  ;;  %v692_v56 = vsub.f32 %v681_v48, %v690_v53 }
 0x5da   :  { %v691_v57 = vsub.f32 %v680_v50, %v689_v55  ;;  %v694_v60 = vmul.f32 %v692_v56, %v692_v56  ;;  %v722_v21 = vmul.f32 %v692_v56, %v109_v23 }
 0x5dc   :  { %v693_v58 = vmul.f32 %v691_v57, %v691_v57  ;;  %v698_v12 = vsel %vm62_vm0, %v694_v60, 0.0  ;;  %v721_v25 = vmul.f32 %v691_v57, %v109_v23 }
 0x5de   :  { %v695_v59 = vsel %vm62_vm0, %v693_v58, 0.0 }
 0x5df   :  { %696 = vadd.xlane.f32.xlu0 %v695_v59 }
 0x5e3   :  { %699 = vadd.xlane.f32.xlu0 %v698_v12 }
 0x668   :  { %v697_v4 = vpop.xlane.xlu0 %696 }
 0x669   :  { %v701_v5 = vmul.f32 0.032258064, %v697_v4 }
 0x66b   :  { %1166 = vrsqrt.f32 %v701_v5  ;;  %vm705_vm2 = vcmp.eq.f32.partialorder %v701_v5, inf  ;;  %v708_v10 = vand.u32 2147483648, %v701_v5  ;;  %vm707_vm3 = vcmp.eq.f32.partialorder %v701_v5, 0.0 }
 0x66c   :  { %v700_v6 = vpop.xlane.xlu0 %699 }
 0x66d   :  { %v702_v7 = vmul.f32 0.032258064, %v700_v6 }
 0x66f   :  { %1168 = vrsqrt.f32 %v702_v7  ;;  %vm712_vm4 = vcmp.eq.f32.partialorder %v702_v7, inf  ;;  %v715_v18 = vand.u32 2147483648, %v702_v7  ;;  %vm714_vm5 = vcmp.eq.f32.partialorder %v702_v7, 0.0 }
 0x678   :  { %v1167_v8 = vpop.eup %1166 }
 0x679   :  { %v704_v9 = vmul.f32 %v1167_v8, %v701_v5 }
 0x67b   :  { %v706_v13 = vsel %vm705_vm2, %v701_v5, %v704_v9 }
 0x67c   :  { %v1169_v14 = vpop.eup %1168  ;;  %v709_v15 = vsel %vm707_vm3, %v708_v10, %v706_v13 }
 0x67d   :  { %v717_v16 = vadd.f32 1e-06, %v709_v15  ;;  %v711_v17 = vmul.f32 %v1169_v14, %v702_v7  ;;  %v111_v14 = vld [vmem:[#allocation7 + $0x1e] ss:$0 sm:$0xff] }
 0x67f   :  { %1170 = vrcp.f32 %v717_v16  ;;  %v713_v19 = vsel %vm712_vm4, %v702_v7, %v711_v17  ;;  %v112_v17 = vld [vmem:[#allocation7 + $0x1f] ss:$0 sm:$0xff] }
 0x680   :  { %v716_v20 = vsel %vm714_vm5, %v715_v18, %v713_v19 }
 0x681   :  { %v718_v22 = vadd.f32 1e-06, %v716_v20 }
 0x683   :  { %1172 = vrcp.f32 %v718_v22 }
 0x68c   :  { %v1171_v26 = vpop.eup %1170 }
 0x68d   :  { %v723_v27 = vmul.f32 %v1171_v26, %v721_v25 }
 0x68f   :  { %v725_v28 = vadd.f32 %v723_v27, %v110_v24 }
 0x690   :  { %v1173_v29 = vpop.eup %1172 }
 0x691   :  { %v724_v30 = vmul.f32 %v1173_v29, %v722_v21  ;;  %1124 = vmatprep.mubr.msk.f32.mxu0 %vm62_vm0, %v725_v28 }
 0x693   :  { %v726_v31 = vadd.f32 %v724_v30, %v110_v24 }
 0x695   :  { %1125 = vmatmul.mubr.msk.f32.vlgmr.msra.gmra.mxu0 %vm62_vm0, %v726_v31 }
 0x755   :  { %v1126_v37 = vpop.f32.mrf.mxu0 }
 0x756   :  { %v805_v38 = vadd.f32 %v1126_v37, %v107_v36 }
 0x757   :  { %v799_v39 = vpop.f32.mrf.mxu0 }
 0x758   :  { %v800_v40 = vadd.f32 %v799_v39, %v107_v36  ;;  %v809_v42 = vmax.f32 %v805_v38, 0.0 }
 0x75a   :  { %v808_v41 = vmax.f32 %v800_v40, 0.0 }
 0x75c   :  { %1143 = vmatprep.mubr.msk.f32.mxu1 %vm388_vm1, %v808_v41 }
 0x75d   :  { %1144 = vmatmul.mubr.msk.f32.vlgmr.msra.gmra.mxu1 %vm388_vm1, %v809_v42 }
 0x81d   :  { %v1145_v44 = vpop.f32.mrf.mxu1 }
 0x81e   :  { %v888_v45 = vadd.f32 %v1145_v44, %v108_v43 }
 0x81f   :  { %v882_v46 = vpop.f32.mrf.mxu1 }
 0x820   :  { %v883_v47 = vadd.f32 %v882_v46, %v108_v43  ;;  %v892_v48 = vadd.f32 %v888_v45, %v726_v31 }
 0x822   :  { %v896_v49 = vsel %vm62_vm0, %v892_v48, 0.0  ;;  %v891_v50 = vadd.f32 %v883_v47, %v725_v28 }
 0x823   :  { %897 = vadd.xlane.f32.xlu0 %v896_v49 }
 0x824   :  { %v893_v51 = vsel %vm62_vm0, %v891_v50, 0.0 }
 0x825   :  { %894 = vadd.xlane.f32.xlu1 %v893_v51 }
 0x8ac   :  { %v898_v52 = vpop.xlane.xlu0 %897 }
 0x8ad   :  { %v900_v53 = vmul.f32 0.03125, %v898_v52 }
 0x8ae   :  { %v895_v54 = vpop.xlane.xlu1 %894 }
 0x8af   :  { %v902_v55 = vsub.f32 %v892_v48, %v900_v53  ;;  %v899_v56 = vmul.f32 0.03125, %v895_v54 }
 0x8b1   :  { %v901_v57 = vsub.f32 %v891_v50, %v899_v56  ;;  %v904_v58 = vmul.f32 %v902_v55, %v902_v55  ;;  %v932_v15 = vmul.f32 %v902_v55, %v111_v14 }
 0x8b3   :  { %v908_v59 = vsel %vm62_vm0, %v904_v58, 0.0  ;;  %v903_v60 = vmul.f32 %v901_v57, %v901_v57  ;;  %v931_v19 = vmul.f32 %v901_v57, %v111_v14 }
 0x8b4   :  { %909 = vadd.xlane.f32.xlu0 %v908_v59 }
 0x8b5   :  { %v905_v12 = vsel %vm62_vm0, %v903_v60, 0.0 }
 0x8b6   :  { %906 = vadd.xlane.f32.xlu1 %v905_v12 }
 0x93d   :  { %v910_v61 = vpop.xlane.xlu0 %909 }
 0x93e   :  { %v912_v11 = vmul.f32 0.032258064, %v910_v61 }
 0x93f   :  { %v907_v62 = vpop.xlane.xlu1 %906 }
 0x940   :  { %1174 = vrsqrt.f32 %v912_v11  ;;  %v911_v63 = vmul.f32 0.032258064, %v907_v62  ;;  %vm922_vm6 = vcmp.eq.f32.partialorder %v912_v11, inf  ;;  %v925_v2 = vand.u32 2147483648, %v912_v11 }
 0x941   :  { %vm924_vm7 = vcmp.eq.f32.partialorder %v912_v11, 0.0 }
 0x942   :  { %1176 = vrsqrt.f32 %v911_v63  ;;  %vm915_vm8 = vcmp.eq.f32.partialorder %v911_v63, inf  ;;  %v918_v8 = vand.u32 2147483648, %v911_v63  ;;  %vm917_vm9 = vcmp.eq.f32.partialorder %v911_v63, 0.0 }
 0x94d   :  { %v1175_v0 = vpop.eup %1174 }
 0x94e   :  { %v921_v1 = vmul.f32 %v1175_v0, %v912_v11 }
 0x94f   :  { %v1177_v3 = vpop.eup %1176 }
 0x950   :  { %v923_v4 = vsel %vm922_vm6, %v912_v11, %v921_v1  ;;  %v914_v6 = vmul.f32 %v1177_v3, %v911_v63 }
 0x951   :  { %v926_v5 = vsel %vm924_vm7, %v925_v2, %v923_v4 }
 0x952   :  { %v928_v7 = vadd.f32 1e-06, %v926_v5  ;;  %v916_v9 = vsel %vm915_vm8, %v911_v63, %v914_v6 }
 0x953   :  { %v919_v10 = vsel %vm917_vm9, %v918_v8, %v916_v9 }
 0x954   :  { %1178 = vrcp.f32 %v928_v7  ;;  %v927_v13 = vadd.f32 1e-06, %v919_v10 }
 0x956   :  { %1180 = vrcp.f32 %v927_v13 }
 0x961   :  { %v1179_v16 = vpop.eup %1178 }
 0x962   :  { %v934_v18 = vmul.f32 %v1179_v16, %v932_v15 }
 0x963   :  { %v1181_v20 = vpop.eup %1180 }
 0x964   :  { %v936_v22 = vadd.f32 %v934_v18, %v112_v17  ;;  %v933_v23 = vmul.f32 %v1181_v20, %v931_v19 }
 0x966   :  { %938 = vst.msk [vmem:[#allocation8 + $0x8] sm:$0xff] %vm62_vm0, %v936_v22  ;;  %v935_v25 = vadd.f32 %v933_v23, %v112_v17 }
 0x968   :  { %937 = vst.msk [vmem:[#allocation8] sm:$0xff] %vm62_vm0, %v935_v25 }
 0x969   :  { %1253 = shalt.err (!%p1250_p5)
}
 0x96a   :  { %950 = dma.vmem_to_hbm [thread:$0]  %s945_s6, 256, %s1452_s3, [#allocation4], %s1272_s22, %s1272_s22, %s1273_s23  }
 0x96b   :  { %1266 = dma.done.wait [#allocation4], 256  }
 0x96c   :  { %1267 = vsyncadd [#allocation4], 4294967040 }
 0x96d   :  { %954 = vsyncpa [#allocation3], 1 }
 0x96e   :  { %955 = vsyncpa [#allocation6], 1 }
 0x96f   :  { %956 = vsyncpa [#allocation4], 1 }

</bundles_post_ra>
